<compile_context>
chip_gen: v7x
topology: tpu7x:2x2x1
jax: 0.10.0
libtpu: 0.0.40
codegen_flags: <defaults>
</compile_context>

<pallas_src>
import functools

import jax
import jax.numpy as jnp
from jax import lax
from jax.experimental import pallas as pl
from jax.experimental.pallas import tpu as pltpu


# -----------------------------------------------------------------------------
# Pallas kernel: row-wise LayerNorm over the last dim with affine weight/bias.
# -----------------------------------------------------------------------------
def _layernorm_kernel(x_ref, wb_ref, o_ref, *, eps, inv_d):
    x = x_ref[...].astype(jnp.float32)                    # (T, D)
    # One pass: two independent reductions (overlap in the XLU FIFO); only the
    # (T, 1) row statistics stay live across the reduction.
    s1 = jnp.sum(x, axis=-1, keepdims=True)                # (T, 1)
    s2 = jnp.sum(x * x, axis=-1, keepdims=True)            # (T, 1)
    mean = s1 * inv_d
    var = jnp.maximum(s2 * inv_d - mean * mean, 0.0)
    inv = lax.rsqrt(var + eps)                             # (T, 1)

    wb = wb_ref[...].astype(jnp.float32)                   # (2, D)
    w = wb[0:1, :]                                         # (1, D)
    b = wb[1:2, :]                                         # (1, D)
    y = ((x - mean) * inv) * w + b
    o_ref[...] = y.astype(o_ref.dtype)


def _round_up(n, m):
    return -(-n // m) * m


def _choose_tile_rows(R, D, itemsize, *, target_bytes=2 << 20,
                      min_grid_steps=4, max_rows=8192):
    """Pick a row tile: big enough to hide per-step overhead (~0.35us), small
    enough to keep several grid steps (pipelining, v7x 2-TC sharding) and to
    fit double-buffered in+out blocks comfortably in VMEM on all generations."""
    if R <= 8:
        return R                                    # block == full array dim
    rows = max(8, (target_bytes // max(1, D * itemsize)) // 8 * 8)
    cap = _round_up(max(8, pl.cdiv(R, min_grid_steps)), 8)
    rows = min(rows, cap, _round_up(max_rows, 8))
    return max(8, rows)


def pallas_layer_norm(x2d, weight, bias, *, out_dim, eps, tile_rows=None):
    """x2d: (R, D_full) rows; weight/bias: (out_dim,).
    LayerNorm over the first `out_dim` columns of each row."""
    R, D_full = x2d.shape
    D = int(out_dim)

    if D != D_full and D % 128 != 0:
        # BlockSpec column slicing needs a lane-aligned width; fall back to a
        # wrapper-side slice for this (rare) case.
        # TODO(synk): lane-dense repack / padded-D kernel for D < 128 widths
        # that differ from x's last dim.
        x2d = x2d[:, :D]
        D_full = D

    wb = jnp.stack([weight, bias], axis=0).astype(jnp.float32)   # (2, D)

    itemsize = jnp.dtype(x2d.dtype).itemsize
    if tile_rows is None:
        tile_rows = _choose_tile_rows(R, D, itemsize)
    grid = (pl.cdiv(R, tile_rows),)

    # Double-buffered input + output blocks (+ tiny wb) with headroom; raise
    # the scoped limit above v5e's 16 MiB default, stay under v7x's 64 MiB.
    block_bytes = tile_rows * D * itemsize
    vmem_limit = int(min(64 << 20, max(32 << 20, 6 * block_bytes)))

    kernel = functools.partial(_layernorm_kernel, eps=float(eps), inv_d=1.0 / D)
    return pl.pallas_call(
        kernel,
        out_shape=jax.ShapeDtypeStruct((R, D), x2d.dtype),
        grid_spec=pltpu.PrefetchScalarGridSpec(
            num_scalar_prefetch=0,
            grid=grid,
            in_specs=[
                # Column block 0 of width D does the x[:, :max_emb] slice via
                # DMA (no extra HBM pass) when D < D_full.
                pl.BlockSpec((tile_rows, D), lambda i: (i, 0)),
                pl.BlockSpec((2, D), lambda i: (0, 0)),
            ],
            out_specs=pl.BlockSpec((tile_rows, D), lambda i: (i, 0)),
        ),
        compiler_params=pltpu.CompilerParams(
            dimension_semantics=("parallel",),
            vmem_limit_bytes=vmem_limit,
        ),
    )(x2d, wb)


# -----------------------------------------------------------------------------
# LayerNormMixture module (forward only, use_argmax=False path).
# -----------------------------------------------------------------------------
class LayerNormMixture:
    def __init__(self, weight, bias, eps, emb_choice_list, pre_norm,
                 before=False, after=False):
        self.weight = weight            # (max_emb,)
        self.bias = bias                # (max_emb,)
        self.eps = float(eps)
        self.emb_choice_list = list(emb_choice_list)
        self.max_emb = max(emb_choice_list)
        self.normalize_before = pre_norm
        self.before = before
        self.after = after

    def _mix_weight_and_bias(self, alphas):
        # Tiny glue (num_choices * max_emb elems). Mix in f32 to match the
        # PyTorch semantics regardless of parameter storage dtype.
        D = self.max_emb
        idx = jnp.arange(D)
        embs = jnp.asarray(self.emb_choice_list)
        masks = (idx[None, :] < embs[:, None]).astype(jnp.float32)   # (C, D)
        coeff = jnp.sum(alphas.astype(jnp.float32)[:, None] * masks, axis=0)
        w = coeff * self.weight.astype(jnp.float32)
        b = coeff * self.bias.astype(jnp.float32)
        return w, b

    def forward(self, x, alphas, *, tile_rows=None):
        # use_argmax == False -> emb_choice forced to max_emb inside
        # maybe_layer_norm, so the slice x[:, :, :max_emb] is used.
        # TODO(synk): use_argmax=True path (argmax-selected sub-embedding with
        # a dynamically smaller output width) is not exercised here.
        assert self.before ^ self.after
        weight, bias = self._mix_weight_and_bias(alphas)
        if self.after ^ self.normalize_before:
            B, S, D_full = x.shape
            x2d = x.reshape(B * S, D_full)        # leading-dim collapse: free
            y2d = pallas_layer_norm(x2d, weight, bias, out_dim=self.max_emb,
                                    eps=self.eps, tile_rows=tile_rows)
            return y2d.reshape(B, S, self.max_emb)
        return x


# Pure-JAX reference for verification.
def reference_forward(x, alphas, weight, bias, eps, emb_choice_list,
                      pre_norm, before, after):
    D = max(emb_choice_list)
    idx = jnp.arange(D)
    w = jnp.zeros((D,), jnp.float32)
    b = jnp.zeros((D,), jnp.float32)
    for i, emb in enumerate(emb_choice_list):
        mask = (idx < emb).astype(jnp.float32)
        w = w + alphas[i] * weight.astype(jnp.float32) * mask
        b = b + alphas[i] * bias.astype(jnp.float32) * mask
    if after ^ pre_norm:
        xs = x[:, :, :D].astype(jnp.float32)
        mean = jnp.mean(xs, axis=-1, keepdims=True)
        var = jnp.mean((xs - mean) ** 2, axis=-1, keepdims=True)
        return (xs - mean) * lax.rsqrt(var + eps) * w + b
    return x


def _run_case(key, B, S, D_full, emb_choice_list, eps=1e-5):
    k_x, k_w, k_b, k_a = jax.random.split(key, 4)
    max_emb = max(emb_choice_list)
    ln_weight = jax.random.normal(k_w, (max_emb,), jnp.float32) * 0.1 + 1.0
    ln_bias = jax.random.normal(k_b, (max_emb,), jnp.float32) * 0.1
    alphas = jax.nn.softmax(
        jax.random.normal(k_a, (len(emb_choice_list),), jnp.float32))
    x = jax.random.normal(k_x, (B, S, D_full), jnp.float32)

    mod = LayerNormMixture(ln_weight, ln_bias, eps, emb_choice_list,
                           pre_norm=True, before=True, after=False)
    out = jax.block_until_ready(mod.forward(x, alphas))
    ref = reference_forward(x, alphas, ln_weight, ln_bias, eps,
                            emb_choice_list, pre_norm=True,
                            before=True, after=False)
    assert out.shape == (B, S, max_emb)
    assert jnp.allclose(out, ref, atol=1e-4, rtol=1e-4), "mismatch vs reference"


if __name__ == "__main__":
    key = jax.random.PRNGKey(0)
    k1, k2, k3 = jax.random.split(key, 3)

    # 1) Main small case: batch=2, seq=8, max embedding=32; choices {16,24,32}.
    _run_case(k1, B=2, S=8, D_full=32, emb_choice_list=[16, 24, 32])

    # 2) Rows not a multiple of the tile (exercises the cdiv/boundary-block
    #    tail path that replaced the old divisibility assert).
    _run_case(k2, B=3, S=5, D_full=32, emb_choice_list=[16, 24, 32])

    # 3) x wider than max_emb with a lane-aligned max_emb (exercises the
    #    BlockSpec-based column slice, no wrapper-side HBM copy).
    _run_case(k3, B=2, S=8, D_full=192, emb_choice_list=[64, 96, 128])

    print("KERNEL_OK")
</pallas_src>

<mosaic_0001>
module attributes {stable_mosaic.version = 11 : i64} {
  func.func @_layernorm_kernel(%arg0: i32, %arg1: memref<8x32xf32, #tpu.memory_space<vmem>>, %arg2: memref<2x32xf32, #tpu.memory_space<vmem>>, %arg3: memref<8x32xf32, #tpu.memory_space<vmem>>) attributes {dimension_semantics = [#tpu.dimension_semantics<parallel>], iteration_bounds = array<i64: 2>, scalar_prefetch = 0 : i64, scratch_operands = 0 : i64, tpu.core_type = #tpu.core_type<tc>, window_params = [{transform_indices = @transform_0, window_bounds = array<i64: 8, 32>}, {pipeline_mode = #tpu.pipeline_mode<synchronous>, transform_indices = @transform_1, window_bounds = array<i64: 2, 32>}, {transform_indices = @transform_2, window_bounds = array<i64: 8, 32>}]} {
    %c0 = arith.constant 0 : index
    %c0_0 = arith.constant 0 : index
    %0 = vector.load %arg1[%c0, %c0_0] : memref<8x32xf32, #tpu.memory_space<vmem>>, vector<8x32xf32>
    %cst = arith.constant dense<0.000000e+00> : vector<8xf32>
    %1 = vector.multi_reduction <add>, %0, %cst [1] : vector<8x32xf32> to vector<8xf32>
    %2 = vector.shape_cast %1 : vector<8xf32> to vector<8x1xf32>
    %3 = arith.mulf %0, %0 : vector<8x32xf32>
    %cst_1 = arith.constant dense<0.000000e+00> : vector<8xf32>
    %4 = vector.multi_reduction <add>, %3, %cst_1 [1] : vector<8x32xf32> to vector<8xf32>
    %5 = vector.shape_cast %4 : vector<8xf32> to vector<8x1xf32>
    %cst_2 = arith.constant 3.125000e-02 : f32
    %6 = vector.broadcast %cst_2 : f32 to vector<8x1xf32>
    %7 = arith.mulf %2, %6 : vector<8x1xf32>
    %cst_3 = arith.constant 3.125000e-02 : f32
    %8 = vector.broadcast %cst_3 : f32 to vector<8x1xf32>
    %9 = arith.mulf %5, %8 : vector<8x1xf32>
    %10 = arith.mulf %7, %7 : vector<8x1xf32>
    %11 = arith.subf %9, %10 : vector<8x1xf32>
    %cst_4 = arith.constant 0.000000e+00 : f32
    %12 = vector.broadcast %cst_4 : f32 to vector<8x1xf32>
    %13 = arith.maximumf %11, %12 : vector<8x1xf32>
    %cst_5 = arith.constant 9.99999974E-6 : f32
    %14 = vector.broadcast %cst_5 : f32 to vector<8x1xf32>
    %15 = arith.addf %13, %14 : vector<8x1xf32>
    %16 = math.rsqrt %15 : vector<8x1xf32>
    %c0_6 = arith.constant 0 : index
    %c0_7 = arith.constant 0 : index
    %17 = vector.load %arg2[%c0_6, %c0_7] : memref<2x32xf32, #tpu.memory_space<vmem>>, vector<2x32xf32>
    %18 = vector.extract_strided_slice %17 {offsets = [0, 0], sizes = [1, 32], strides = [1, 1]} : vector<2x32xf32> to vector<1x32xf32>
    %19 = vector.extract_strided_slice %17 {offsets = [1, 0], sizes = [1, 32], strides = [1, 1]} : vector<2x32xf32> to vector<1x32xf32>
    %20 = vector.broadcast %7 : vector<8x1xf32> to vector<8x32xf32>
    %21 = arith.subf %0, %20 : vector<8x32xf32>
    %22 = vector.broadcast %16 : vector<8x1xf32> to vector<8x32xf32>
    %23 = arith.mulf %21, %22 : vector<8x32xf32>
    %24 = vector.broadcast %18 : vector<1x32xf32> to vector<8x32xf32>
    %25 = arith.mulf %23, %24 : vector<8x32xf32>
    %26 = vector.broadcast %19 : vector<1x32xf32> to vector<8x32xf32>
    %27 = arith.addf %25, %26 : vector<8x32xf32>
    %c0_8 = arith.constant 0 : index
    %c0_9 = arith.constant 0 : index
    %28 = vector.load %arg3[%c0_8, %c0_9] : memref<8x32xf32, #tpu.memory_space<vmem>>, vector<8x32xf32>
    tpu.vector_store %arg3[%c0_8, %c0_9], %27 {strides = array<i32>} : memref<8x32xf32, #tpu.memory_space<vmem>>, vector<8x32xf32>,
    return
  }
  func.func @transform_0(%arg0: i32) -> (i32, i32) {
    %c0_i32 = arith.constant 0 : i32
    %c0_i32_0 = arith.constant 0 : i32
    return %arg0, %c0_i32 : i32, i32
  }
  func.func @transform_1(%arg0: i32) -> (i32, i32) {
    %c0_i32 = arith.constant 0 : i32
    %c0_i32_0 = arith.constant 0 : i32
    %c0_i32_1 = arith.constant 0 : i32
    return %c0_i32, %c0_i32_0 : i32, i32
  }
  func.func @transform_2(%arg0: i32) -> (i32, i32) {
    %c0_i32 = arith.constant 0 : i32
    %c0_i32_0 = arith.constant 0 : i32
    return %arg0, %c0_i32 : i32, i32
  }
}

</mosaic_0001>

<bundles_post_ra>
// kernel: tpu_custom_call.1
= control target key start
LH: loop header
LB: loop body
LE: loop exit
PB: predicated region body
PF: predicated region fallthrough
CT: control target
= control target key end

     0   :  { %7 = vsyncpa [#allocation3], 0  ;;  %s619_s0 = inlined_call_operand.hbm [shape: f32[16,32], index: 0, kind: input, shape index: {}]   ;;  %s620_s1 = inlined_call_operand.vmem [shape: f32[2,32], index: 1, kind: input, shape index: {}]   ;;  %s621_s2 = inlined_call_operand.hbm [shape: f32[16,32], index: 2, kind: output, shape index: {}]  }
   0x1   :  { %9 = vsyncpa [#allocation3 + $0x1], 0 }
   0x2   :  { %10 = vsyncpa [#allocation4], 0 }
   0x3   :  { %12 = vsyncpa [#allocation4 + $0x1], 0  ;;  %s448_s9 = smov 0   ;;  %s450_s10 = smov 0  }
   0x4   :  { %s452_s11 = smov 0   ;;  %s454_s12 = smov 0  }
   0x5 LB: > { %s469_s13 = sadd.s32 4294967295, %s429_s12   ;;  %s273_s14 = sadd.s32 4294967294, %s429_s12   ;;  %s429_s12 = sphi %s454_s12, %s636_s12   ;;  %s425_s11 = sphi %s452_s11, %s635_s11   ;;  %s421_s10 = sphi %s450_s10, %s634_s10   ;;  %s417_s9 = sphi %s448_s9, %s633_s9  }
   0x6   : > { %s473_s15 = sadd.s32 1, %s429_s12   ;;  %s25_s16 = sadd.s32 1, %s425_s11 }
   0x7   : > { %s22_s17 = ssub.s32 %s429_s12, %s473_s15  ;;  %p32_p0 = scmp.ne.s32.totalorder %s425_s11, %s421_s10 }
   0x8   : > { %p23_p1 = scmp.eq.s32.totalorder %s22_s17, 0  ;;  %p33_p2 = scmp.eq.s32.totalorder %s429_s12, 0 }
   0x9   : > { %p38_p3 = scmp.ne.s32.totalorder %s421_s10, %s417_s9  ;;  %p39_p4 = scmp.eq.s32.totalorder %s469_s13, 0 }
   0xa   : > { %s485_s18 = scalar_select %p23_p1, %s425_s11, %s25_s16  }
   0xb   : > { %p487_p5 = por %p33_p2, %p32_p0  ;;  %p491_p6 = por %p39_p4, %p38_p3 }
   0xc   : > { %p83_p7 = scmp.eq.s32.totalorder %s469_s13, 1  ;;  %p89_p8 = scmp.eq.s32.totalorder %s273_s14, 1 }
   0xd   : > { %p297_p10 = scmp.lt.s32.totalorder %s429_s12, 2  ;;  %s112_s23 = sand.u32 1, %s425_s11  }
   0xe   : > { %p498_p11 = por %p83_p7, %p32_p0  ;;  %p502_p12 = por %p89_p8, %p38_p3 }
   0xf   : > { %s277_s24 = sshll.u32 %s429_s12, 7  ;;  %s276_s25 = sshll.u32 %s112_s23, 3 }
  0x10   : > { %s625_s21 = scalar_select %p498_p11, 1, 0 }
  0x11   : > { %s626_s22 = scalar_select %p502_p12, 1, 0 }
  0x12   : > { %s511_s28 = scalar_lea.hbm %s619_s0, %s277_s24  ;;  %s116_s29 = scalar_lea.vmem [#allocation2], %s276_s25 }
  0x13   : > { %s123_s30 = sshll.u32 %s116_s29, 4  ;;  %p515_p13 = pnand %p297_p10, %p487_p5  ;;  %s519_s30 = int_to_ptr.vmem [resolvable:$true] %s123_s30 }
  0x14   : > { %s113_s4 = scalar_lea.sflag [#allocation3], %s112_s23  ;;  %s333_s5 = scalar_lea.hbm %s511_s28, 128 }
  0x15   : > { %p334_p2 = scmp.ne.s32.totalorder %s511_s28, %s333_s5  ;;  %p335_p3 = pneg %p515_p13 }
  0x16   : > { %s338_s8 = scalar_lea.hbm %s619_s0, 256  ;;  %p339_p5 = scmp.lt.u32.totalorder %s511_s28, %s619_s0 }
  0x17   : > { %p336_p4 = pnand %p335_p3, %p334_p2  ;;  %p340_p8 = scmp.lt.u32.totalorder %s338_s8, %s333_s5 }
  0x18   : > { %p342_p9 = scmp.lt.u32.totalorder %s333_s5, %s511_s28 }
  0x19   : > { %p337_p7 = pneg %p336_p4  ;;  %p341_p10 = por %p340_p8, %p339_p5 }
  0x1b   : > { %p343_p0 = por %p342_p9, %p341_p10 }
  0x1d   : > { %p344_p1 = pnand %p343_p0, %p337_p7 }
  0x1f   : > { %347 = shalt.err (!%p344_p1)
}
  0x20   : > { %s348_s17 = scalar_lea.vmem %s519_s30, 128  ;;  %s431_s19 = smov [#allocation2]  }
  0x21   : > { %p349_p2 = scmp.ne.s32.totalorder %s519_s30, %s348_s17  ;;  %s353_s23 = sshll.u32 %s431_s19, 4  ;;  %s354_s23 = int_to_ptr.vmem [resolvable:$false] %s353_s23 }
  0x22   : > { %s355_s24 = scalar_lea.vmem %s354_s23, 256  ;;  %p356_p11 = scmp.lt.s32.totalorder %s519_s30, %s354_s23 }
  0x23   : > { %p351_p4 = pnand %p349_p2, %p335_p3  ;;  %p357_p5 = scmp.lt.s32.totalorder %s355_s24, %s348_s17 }
  0x25   : > { %p352_p12 = pneg %p351_p4  ;;  %p358_p8 = por %p357_p5, %p356_p11 }
  0x27   : > { %p359_p9 = pnand %p358_p8, %p352_p12 }
  0x29   : > { %362 = shalt.err (!%p359_p9)
}
  0x2a   : > { %292 = dma.hbm_to_vmem [thread:$0]  (!%p515_p13), %s511_s28, 128, %s519_s30, %s113_s4  }
  0x2b   : > { %p628_p0 = scmp.lt.s32.totalorder %s429_s12, 3  ;;  %p629_p1 = scmp.ge.s32.totalorder %s429_s12, 1 }
  0x2d   : > { %p129_p3 = pnand %p629_p1, %p628_p0 }
  0x2e   : > { %s553_s25 = sand.u32 (!%p129_p3), 1, %s421_s10  }
  0x2f   : > { %132 = sbr.rel (%p129_p3) target bundleno = 242 (0xf2), region = 28  ;;  %s279_s26 = sshll.u32 (!%p129_p3), %s553_s25, 3 }
  0x30   : > { %s135_s27 = scalar_lea.sflag (!%p129_p3), [#allocation3], %s553_s25  ;;  %s138_s29 = scalar_lea.vmem (!%p129_p3), [#allocation2], %s279_s26 }
  0x36   : > { %408 = dma.done.wait (%p491_p6), %s135_s27, 128  }
  0x37   : > { %410 = vsyncadd (%p491_p6), %s135_s27, 4294967168  ;;  %vm160_vm0 = vcmask 261120   ;;  %v159_v0 = vld [vmem:[%s138_s29] sm:$0xff]  ;;  %v178_v11 = vlaneseq  ;;  %s282_s30 = sshll.u32 %s469_s13, 7  ;;  %s158_s3 = scalar_lea.vmem [#allocation5], %s279_s26 }
  0x38   : > { %v161_v1 = vsel %vm160_vm0, %v159_v0, 0.0  ;;  %v164_v2 = vmul.f32 %v159_v0, %v159_v0  ;;  %v175_v15 = vld [vmem:[%s620_s1] sm:$0x3]  ;;  %s203_s4 = sshll.u32 %s158_s3, 4  ;;  %s574_s7 = scalar_lea.hbm %s621_s2, %s282_s30  ;;  %s576_s4 = int_to_ptr.vmem [resolvable:$true] %s203_s4 }
  0x39   : > { %162 = vadd.xlane.f32.xlu0 %v161_v1  ;;  %v179_v13 = vshrl.u32 %v178_v11, 7  ;;  %s190_s8 = scalar_lea.sflag [#allocation4], %s553_s25  ;;  %s363_s14 = scalar_lea.vmem %s576_s4, 128 }
  0x3a   : > { %v165_v3 = vsel %vm160_vm0, %v164_v2, 0.0  ;;  %p364_p6 = scmp.ne.s32.totalorder %s576_s4, %s363_s14  ;;  %p630_p11 = scmp.ne.s32.totalorder %s625_s21, 0 }
  0x3b   : > { %v180_v14 = vsub.s32 0, %v179_v13  ;;  %v185_v16 = vsub.s32 1, %v179_v13  ;;  %s432_s13 = smov [#allocation5]  }
  0x3c   : > { %p365_p12 = pnand %p364_p6, %p630_p11  ;;  %s367_s16 = sshll.u32 %s432_s13, 4  ;;  %s368_s16 = int_to_ptr.vmem [resolvable:$false] %s367_s16 }
  0x3d   : > { %166 = vadd.xlane.f32.xlu0 %v165_v3  ;;  %v181_v18 = vrot.slane %v175_v15, %v180_v14  ;;  %v186_v21 = vrot.slane %v175_v15, %v185_v16  ;;  %s369_s17 = scalar_lea.vmem %s368_s16, 256  ;;  %p370_p7 = scmp.lt.s32.totalorder %s576_s4, %s368_s16 }
  0x3e   : > { %p366_p13 = pneg %p365_p12  ;;  %p371_p10 = scmp.lt.s32.totalorder %s369_s17, %s363_s14 }
  0x40   : > { %p372_p2 = por %p371_p10, %p370_p7 }
  0x42   : > { %p373_p4 = pnand %p372_p2, %p366_p13 }
  0xc6   : > { %v163_v4 = vpop.xlane.xlu0 %162 }
  0xc7   : > { %v168_v5 = vmul.f32 0.03125, %v163_v4 }
  0xc9   : > { %v170_v7 = vmul.f32 %v168_v5, %v168_v5  ;;  %v176_v17 = vsub.f32 %v159_v0, %v168_v5 }
  0xca   : > { %v167_v6 = vpop.xlane.xlu0 %166 }
  0xcb   : > { %v169_v8 = vmul.f32 0.03125, %v167_v6 }
  0xcd   : > { %v171_v9 = vsub.f32 %v169_v8, %v170_v7 }
  0xcf   : > { %v172_v10 = vmax.f32 %v171_v9, 0.0 }
  0xd1   : > { %v173_v12 = vadd.f32 1e-05, %v172_v10 }
  0xd3   : > { %331 = vrsqrt.f32 %v173_v12 }
  0xdd   : > { %v332_v19 = vpop.eup %331 }
  0xde   : > { %v177_v20 = vmul.f32 %v332_v19, %v176_v17 }
  0xe0   : > { %v182_v22 = vmul.f32 %v181_v18, %v177_v20 }
  0xe2   : > { %v187_v23 = vadd.f32 %v186_v21, %v182_v22 }
  0xe4   : > { %188 = vst.msk [vmem:[%s158_s3] sm:$0xff] %vm160_vm0, %v187_v23 }
  0xe5   : > { %376 = shalt.err (!%p373_p4)
}
  0xe6   : > { %s377_s19 = scalar_lea.hbm %s574_s7, 128  ;;  %s381_s25 = scalar_lea.hbm %s621_s2, 256 }
  0xe7   : > { %p378_p5 = scmp.ne.s32.totalorder %s574_s7, %s377_s19  ;;  %p382_p0 = scmp.lt.u32.totalorder %s574_s7, %s621_s2 }
  0xe8   : > { %p383_p1 = scmp.lt.u32.totalorder %s381_s25, %s377_s19  ;;  %p385_p6 = scmp.lt.u32.totalorder %s377_s19, %s574_s7 }
  0xe9   : > { %p379_p8 = pnand %p378_p5, %p630_p11 }
  0xea   : > { %p384_p3 = por %p383_p1, %p382_p0 }
  0xeb   : > { %p380_p9 = pneg %p379_p8 }
  0xec   : > { %p386_p12 = por %p385_p6, %p384_p3 }
  0xee   : > { %p387_p13 = pnand %p386_p12, %p380_p9 }
  0xf0   : > { %390 = shalt.err (!%p387_p13)
}
  0xf1   : > { %287 = dma.vmem_to_hbm [thread:$0]  (%p630_p11), %s576_s4, 128, %s574_s7, %s190_s8  }
  0xf2 PF: > { %s215_s29 = sand.u32 1, %s417_s9   ;;  %p631_p7 = scmp.ne.s32.totalorder %s626_s22, 0 }
  0xf3   : > { %p632_p10 = scmp.ge.s32.totalorder %s429_s12, 2  ;;  %s216_s20 = scalar_lea.sflag [#allocation4], %s215_s29 }
  0xf5   : > { %p294_p2 = pnand %p632_p10, %p631_p7 }
  0xf7   : > { %412 = dma.done.wait (!%p294_p2), %s216_s20, 128  }
  0xf8   : > { %414 = vsyncadd (!%p294_p2), %s216_s20, 4294967168  ;;  %p15_p4 = scmp.ge.s32.totalorder %s473_s15, 4   ;;  %s633_s9 = smov %s421_s10 }
  0xf9   : > { %s634_s10 = smov %s425_s11  ;;  %s635_s11 = smov %s485_s18 }
  0xfa   : > { %s636_s12 = smov %s473_s15  ;;  %17 = sbr.rel (!%p15_p4) target bundleno = 5 (0x5), region = 73 }
 0x101   :  { %221 = vsyncpa [#allocation3], 1 }
 0x102   :  { %223 = vsyncpa [#allocation3 + $0x1], 1 }
 0x103   :  { %224 = vsyncpa [#allocation4], 1 }
 0x104   :  { %226 = vsyncpa [#allocation4 + $0x1], 1 }

</bundles_post_ra>
